<compile_context>
chip_gen: v6e
topology: v6e:2x2x1
jax: 0.10.0
libtpu: 0.0.40
codegen_flags: <defaults>
</compile_context>

<pallas_src>
import functools

import jax
import jax.numpy as jnp
from jax.experimental import pallas as pl
from jax.experimental.pallas import tpu as pltpu

LANE = 128      # lane width (last-dim vreg extent); prefer 256-multiples on v6e/v7x
SUBLANE = 8     # sublane width (second-to-last-dim vreg extent, f32)


def _round_up(x, m):
    return ((x + m - 1) // m) * m


# ---------------- Fused Pallas kernel ----------------

def _fnn_fused_kernel(*refs, num_layers):
    """refs = (x_ref, w1, b1, w2, b2, ..., wN, bN, o_ref).

    x: [tm, K0] (native dtype), weights bf16 [kin, kout], biases f32 [1, kout],
    output [tm, Np] f32.  Intermediates never leave VMEM/vregs.
    """
    x_ref = refs[0]
    o_ref = refs[-1]

    # nn.Flatten happened in the wrapper; the activation applied after Flatten
    # in the PyTorch loop becomes a ReLU on the flattened input.  Activation
    # math in f32 (v5e has no bf16 VALU), then a single cast to the bf16
    # carrier used for every MXU matmul.
    h = jnp.maximum(x_ref[...].astype(jnp.float32), 0.0).astype(jnp.bfloat16)

    for layer in range(num_layers):
        w_ref = refs[1 + 2 * layer]
        b_ref = refs[2 + 2 * layer]
        # bf16 operands on the MXU, f32 accumulation, f32 bias/ReLU epilogue.
        y = jnp.dot(h, w_ref[...], preferred_element_type=jnp.float32) + b_ref[...]
        if layer < num_layers - 1:          # no activation after the last Linear
            h = jnp.maximum(y, 0.0).astype(jnp.bfloat16)
        else:
            o_ref[...] = y.astype(o_ref.dtype)


# ---------------- Wrapper ----------------

@functools.partial(jax.jit, static_argnames=("output_dim", "block_m"))
def fnn_forward(x, params, *, output_dim, block_m=256):
    """x: [B, ...] (any trailing dims, flattened); params: list of
    (W_bf16 [kin_padded, kout_padded], b_f32 [1, kout_padded]) from
    init_fnn_params (all output widths lane-padded).  Returns [B, output_dim] f32.
    """
    B = x.shape[0]
    xf = x.reshape(B, -1)                    # nn.Flatten (keep native dtype)
    K0 = xf.shape[1]

    num_layers = len(params)
    Np = params[-1][0].shape[1]              # lane-padded final width

    # Batch tiling: small batches use one full-dim block (no jnp.pad of x);
    # large batches get an M-grid so x DMA / out store pipeline against MXU work.
    if B <= block_m:
        tm, grid_m = B, 1
    else:
        tm, grid_m = block_m, pl.cdiv(B, block_m)

    operands = [xf]
    in_specs = [pl.BlockSpec((tm, K0), lambda i: (i, 0))]
    flops = 0
    weight_bytes = 0
    max_width = K0
    for w, b in params:
        kin, kout = w.shape
        operands += [w, b]
        # Index-invariant -> fetched once, VMEM-resident across the M-grid.
        in_specs += [
            pl.BlockSpec((kin, kout), lambda i: (0, 0)),
            pl.BlockSpec((1, kout), lambda i: (0, 0)),
        ]
        flops += 2 * B * kin * kout
        weight_bytes += w.size * w.dtype.itemsize + b.size * 4
        max_width = max(max_width, kout)

    # Explicit VMEM budget: resident weights (double-buffered by the pipeline),
    # pipelined x/out tiles, widest f32 intermediate; 25% margin, capped with
    # headroom under v7x's 64 MiB physical VMEM.
    x_tile_bytes = tm * K0 * xf.dtype.itemsize
    out_tile_bytes = tm * Np * 4
    h_bytes = tm * max_width * 4
    vmem_needed = 2 * (weight_bytes + x_tile_bytes + out_tile_bytes) + 4 * h_bytes
    vmem_limit = int(min(max(vmem_needed * 5 // 4, 8 << 20), 56 << 20))

    bytes_accessed = xf.size * xf.dtype.itemsize + B * Np * 4 + weight_bytes

    kernel = functools.partial(_fnn_fused_kernel, num_layers=num_layers)

    out = pl.pallas_call(
        kernel,
        out_shape=jax.ShapeDtypeStruct((B, Np), jnp.float32),
        grid=(grid_m,),
        in_specs=in_specs,
        out_specs=pl.BlockSpec((tm, Np), lambda i: (i, 0)),
        compiler_params=pltpu.CompilerParams(
            dimension_semantics=("parallel",),
            vmem_limit_bytes=vmem_limit),
        cost_estimate=pl.CostEstimate(
            flops=flops, transcendentals=0, bytes_accessed=bytes_accessed),
    )(*operands)

    return out[:, :output_dim]


# ---------------- Parameter init (deterministic, PyTorch-style uniform) ----------------

def init_fnn_params(key, input_dim, hidden_layers, output_dim, pad_to=LANE):
    """Weights [in, out] in bf16 (transposed vs PyTorch nn.Linear), biases [1, out] f32.

    Every layer's OUTPUT width is zero-padded to a multiple of `pad_to` (and the
    next layer's input rows padded to match) so all matmuls are lane-aligned and
    the HBM store is lane-dense.  Padded columns stay exactly 0 through bias+ReLU.
    """
    dims = [input_dim] + list(hidden_layers) + [output_dim]
    params = []
    fin_p = input_dim                        # first layer input stays unpadded
    for fin, fout in zip(dims[:-1], dims[1:]):
        key, wk, bk = jax.random.split(key, 3)
        bound = 1.0 / (fin ** 0.5)
        w = jax.random.uniform(wk, (fin, fout), jnp.float32, -bound, bound)
        b = jax.random.uniform(bk, (1, fout), jnp.float32, -bound, bound)
        fout_p = _round_up(fout, pad_to)
        w = jnp.pad(w, ((0, fin_p - fin), (0, fout_p - fout)))
        b = jnp.pad(b, ((0, 0), (0, fout_p - fout)))
        params.append((w.astype(jnp.bfloat16), b))
        fin_p = fout_p
    return params


# ---------------- Pure-JAX reference (identical numerics: bf16 carrier, f32 accumulate) ----------------

def fnn_reference(x, params, output_dim):
    B = x.shape[0]
    h = jnp.maximum(x.reshape(B, -1).astype(jnp.float32), 0.0).astype(jnp.bfloat16)
    n = len(params)
    y = None
    for li, (w, b) in enumerate(params):
        y = jnp.dot(h, w, preferred_element_type=jnp.float32) + b
        if li < n - 1:
            h = jnp.maximum(y, 0.0).astype(jnp.bfloat16)
    return y[:, :output_dim]


if __name__ == "__main__":
    key = jax.random.PRNGKey(0)
    xk, pk = jax.random.split(key)

    # Small shapes consistent with the module: batch=2, input flattened from (4,16,16).
    B, C, H, W = 2, 4, 16, 16
    input_dim = C * H * W                # 1024
    hidden_layers = [32, 32]
    output_dim = 8

    x = jax.random.normal(xk, (B, C, H, W), dtype=jnp.float32)
    params = init_fnn_params(pk, input_dim, hidden_layers, output_dim)

    out = fnn_forward(x, params, output_dim=output_dim)
    out = jax.block_until_ready(out)
    assert out.shape == (B, output_dim)

    ref = fnn_reference(x, params, output_dim)
    assert jnp.allclose(out, ref, rtol=2e-3, atol=2e-3), "mismatch vs reference"

    print("KERNEL_OK")
</pallas_src>

<mosaic_0001>
module attributes {stable_mosaic.version = 11 : i64} {
  func.func @_fnn_fused_kernel(%arg0: i32, %arg1: memref<2x1024xf32, #tpu.memory_space<vmem>>, %arg2: memref<1024x128xbf16, #tpu.memory_space<vmem>>, %arg3: memref<1x128xf32, #tpu.memory_space<vmem>>, %arg4: memref<128x128xbf16, #tpu.memory_space<vmem>>, %arg5: memref<1x128xf32, #tpu.memory_space<vmem>>, %arg6: memref<128x128xbf16, #tpu.memory_space<vmem>>, %arg7: memref<1x128xf32, #tpu.memory_space<vmem>>, %arg8: memref<2x128xf32, #tpu.memory_space<vmem>>) attributes {dimension_semantics = [#tpu.dimension_semantics<parallel>], iteration_bounds = array<i64: 1>, scalar_prefetch = 0 : i64, scratch_operands = 0 : i64, tpu.core_type = #tpu.core_type<tc>, window_params = [{transform_indices = @transform_0, window_bounds = array<i64: 2, 1024>}, {pipeline_mode = #tpu.pipeline_mode<synchronous>, transform_indices = @transform_1, window_bounds = array<i64: 1024, 128>}, {pipeline_mode = #tpu.pipeline_mode<synchronous>, transform_indices = @transform_2, window_bounds = array<i64: 1, 128>}, {pipeline_mode = #tpu.pipeline_mode<synchronous>, transform_indices = @transform_3, window_bounds = array<i64: 128, 128>}, {pipeline_mode = #tpu.pipeline_mode<synchronous>, transform_indices = @transform_4, window_bounds = array<i64: 1, 128>}, {pipeline_mode = #tpu.pipeline_mode<synchronous>, transform_indices = @transform_5, window_bounds = array<i64: 128, 128>}, {pipeline_mode = #tpu.pipeline_mode<synchronous>, transform_indices = @transform_6, window_bounds = array<i64: 1, 128>}, {transform_indices = @transform_7, window_bounds = array<i64: 2, 128>}]} {
    %c0 = arith.constant 0 : index
    %c0_0 = arith.constant 0 : index
    %0 = vector.load %arg1[%c0, %c0_0] : memref<2x1024xf32, #tpu.memory_space<vmem>>, vector<2x1024xf32>
    %cst = arith.constant 0.000000e+00 : f32
    %1 = vector.broadcast %cst : f32 to vector<2x1024xf32>
    %2 = arith.maximumf %0, %1 : vector<2x1024xf32>
    %3 = arith.truncf %2 : vector<2x1024xf32> to vector<2x1024xbf16>
    %c0_1 = arith.constant 0 : index
    %c0_2 = arith.constant 0 : index
    %4 = vector.load %arg2[%c0_1, %c0_2] : memref<1024x128xbf16, #tpu.memory_space<vmem>>, vector<1024x128xbf16>
    %cst_3 = arith.constant dense<0.000000e+00> : vector<2x128xf32>
    %5 = tpu.matmul %3, %4, %cst_3 {dimension_numbers = #tpu.dot_dimension_numbers<[1], [0], [0], [1], [0, 0, 1, 1], [], []>} : vector<2x1024xbf16>, vector<1024x128xbf16>, vector<2x128xf32> -> vector<2x128xf32>
    %c0_4 = arith.constant 0 : index
    %c0_5 = arith.constant 0 : index
    %6 = vector.load %arg3[%c0_4, %c0_5] : memref<1x128xf32, #tpu.memory_space<vmem>>, vector<1x128xf32>
    %7 = vector.broadcast %6 : vector<1x128xf32> to vector<2x128xf32>
    %8 = arith.addf %5, %7 : vector<2x128xf32>
    %cst_6 = arith.constant 0.000000e+00 : f32
    %9 = vector.broadcast %cst_6 : f32 to vector<2x128xf32>
    %10 = arith.maximumf %8, %9 : vector<2x128xf32>
    %11 = arith.truncf %10 : vector<2x128xf32> to vector<2x128xbf16>
    %c0_7 = arith.constant 0 : index
    %c0_8 = arith.constant 0 : index
    %12 = vector.load %arg4[%c0_7, %c0_8] : memref<128x128xbf16, #tpu.memory_space<vmem>>, vector<128x128xbf16>
    %cst_9 = arith.constant dense<0.000000e+00> : vector<2x128xf32>
    %13 = tpu.matmul %11, %12, %cst_9 {dimension_numbers = #tpu.dot_dimension_numbers<[1], [0], [0], [1], [0, 0, 1, 1], [], []>} : vector<2x128xbf16>, vector<128x128xbf16>, vector<2x128xf32> -> vector<2x128xf32>
    %c0_10 = arith.constant 0 : index
    %c0_11 = arith.constant 0 : index
    %14 = vector.load %arg5[%c0_10, %c0_11] : memref<1x128xf32, #tpu.memory_space<vmem>>, vector<1x128xf32>
    %15 = vector.broadcast %14 : vector<1x128xf32> to vector<2x128xf32>
    %16 = arith.addf %13, %15 : vector<2x128xf32>
    %cst_12 = arith.constant 0.000000e+00 : f32
    %17 = vector.broadcast %cst_12 : f32 to vector<2x128xf32>
    %18 = arith.maximumf %16, %17 : vector<2x128xf32>
    %19 = arith.truncf %18 : vector<2x128xf32> to vector<2x128xbf16>
    %c0_13 = arith.constant 0 : index
    %c0_14 = arith.constant 0 : index
    %20 = vector.load %arg6[%c0_13, %c0_14] : memref<128x128xbf16, #tpu.memory_space<vmem>>, vector<128x128xbf16>
    %cst_15 = arith.constant dense<0.000000e+00> : vector<2x128xf32>
    %21 = tpu.matmul %19, %20, %cst_15 {dimension_numbers = #tpu.dot_dimension_numbers<[1], [0], [0], [1], [0, 0, 1, 1], [], []>} : vector<2x128xbf16>, vector<128x128xbf16>, vector<2x128xf32> -> vector<2x128xf32>
    %c0_16 = arith.constant 0 : index
    %c0_17 = arith.constant 0 : index
    %22 = vector.load %arg7[%c0_16, %c0_17] : memref<1x128xf32, #tpu.memory_space<vmem>>, vector<1x128xf32>
    %23 = vector.broadcast %22 : vector<1x128xf32> to vector<2x128xf32>
    %24 = arith.addf %21, %23 : vector<2x128xf32>
    %c0_18 = arith.constant 0 : index
    %c0_19 = arith.constant 0 : index
    %25 = vector.load %arg8[%c0_18, %c0_19] : memref<2x128xf32, #tpu.memory_space<vmem>>, vector<2x128xf32>
    tpu.vector_store %arg8[%c0_18, %c0_19], %24 {strides = array<i32>} : memref<2x128xf32, #tpu.memory_space<vmem>>, vector<2x128xf32>,
    return
  }
  func.func @transform_0(%arg0: i32) -> (i32, i32) {
    %c0_i32 = arith.constant 0 : i32
    %c0_i32_0 = arith.constant 0 : i32
    return %arg0, %c0_i32 : i32, i32
  }
  func.func @transform_1(%arg0: i32) -> (i32, i32) {
    %c0_i32 = arith.constant 0 : i32
    %c0_i32_0 = arith.constant 0 : i32
    %c0_i32_1 = arith.constant 0 : i32
    return %c0_i32, %c0_i32_0 : i32, i32
  }
  func.func @transform_2(%arg0: i32) -> (i32, i32) {
    %c0_i32 = arith.constant 0 : i32
    %c0_i32_0 = arith.constant 0 : i32
    %c0_i32_1 = arith.constant 0 : i32
    return %c0_i32, %c0_i32_0 : i32, i32
  }
  func.func @transform_3(%arg0: i32) -> (i32, i32) {
    %c0_i32 = arith.constant 0 : i32
    %c0_i32_0 = arith.constant 0 : i32
    %c0_i32_1 = arith.constant 0 : i32
    return %c0_i32, %c0_i32_0 : i32, i32
  }
  func.func @transform_4(%arg0: i32) -> (i32, i32) {
    %c0_i32 = arith.constant 0 : i32
    %c0_i32_0 = arith.constant 0 : i32
    %c0_i32_1 = arith.constant 0 : i32
    return %c0_i32, %c0_i32_0 : i32, i32
  }
  func.func @transform_5(%arg0: i32) -> (i32, i32) {
    %c0_i32 = arith.constant 0 : i32
    %c0_i32_0 = arith.constant 0 : i32
    %c0_i32_1 = arith.constant 0 : i32
    return %c0_i32, %c0_i32_0 : i32, i32
  }
  func.func @transform_6(%arg0: i32) -> (i32, i32) {
    %c0_i32 = arith.constant 0 : i32
    %c0_i32_0 = arith.constant 0 : i32
    %c0_i32_1 = arith.constant 0 : i32
    return %c0_i32, %c0_i32_0 : i32, i32
  }
  func.func @transform_7(%arg0: i32) -> (i32, i32) {
    %c0_i32 = arith.constant 0 : i32
    %c0_i32_0 = arith.constant 0 : i32
    return %arg0, %c0_i32 : i32, i32
  }
}

</mosaic_0001>

<bundles_post_ra>
// kernel: fnn_forward.1
= control target key start
LH: loop header
LB: loop body
LE: loop exit
PB: predicated region body
PF: predicated region fallthrough
CT: control target
= control target key end

     0   :  { %12 = vsyncpa [#allocation3], 0  ;;  %s1519_s0 = inlined_call_operand.vmem [shape: f32[2,1024], index: 0, kind: input, shape index: {}]   ;;  %s1520_s1 = inlined_call_operand.hbm [shape: bf16[1024,128], index: 1, kind: input, shape index: {}]   ;;  %s1521_s2 = inlined_call_operand.vmem [shape: f32[1,128], index: 2, kind: input, shape index: {}]   ;;  %s1522_s3 = inlined_call_operand.vmem [shape: bf16[128,128], index: 3, kind: input, shape index: {}]   ;;  %s1523_s4 = inlined_call_operand.vmem [shape: f32[1,128], index: 4, kind: input, shape index: {}]   ;;  %s1524_s5 = inlined_call_operand.vmem [shape: bf16[128,128], index: 5, kind: input, shape index: {}]   ;;  %s1525_s6 = inlined_call_operand.vmem [shape: f32[1,128], index: 6, kind: input, shape index: {}]   ;;  %s1526_s7 = inlined_call_operand.hbm [shape: f32[2,128], index: 7, kind: output, shape index: {}]  }
   0x1   :  { %13 = vsyncpa [#allocation4], 0  ;;  %s1379_s24 = smov [#allocation2]  }
   0x2   :  { %s21_s25 = sshll.u32 %s1379_s24, 4  ;;  %s22_s25 = int_to_ptr.vmem [resolvable:$true] %s21_s25 }
   0x3   :  { %s1343_s26 = scalar_lea.vmem %s22_s25, 8192  ;;  %p1348_p1 = scmp.lt.s32.totalorder %s22_s25, %s22_s25 }
   0x4   :  { %p1344_p0 = scmp.ne.s32.totalorder %s22_s25, %s1343_s26  ;;  %p1349_p2 = scmp.lt.s32.totalorder %s1343_s26, %s1343_s26 }
   0x6   :  { %p1350_p3 = por %p1349_p2, %p1348_p1 }
   0x8   :  { %p1351_p4 = pnand %p1350_p3, %p1344_p0 }
   0xa   :  { %1354 = shalt.err (!%p1351_p4)
}
   0xb   :  { %s1380_s27 = smov 64   ;;  %s1381_s28 = smov 4  }
   0xc   :  { %27 = dma.hbm_to_vmem [thread:$0]  %s1520_s1, 8192, %s22_s25, [#allocation3], %s1380_s27, %s1380_s27, %s1381_s28  }
   0xd   :  { %1375 = dma.done.wait [#allocation3], 8192  }
   0xe   :  { %1376 = vsyncadd [#allocation3], 4294959104  ;;  %v1255_v0 = vld [vmem:[#allocation2 + $0x78] sm:$0xff]   ;;  %v1259_v4 = vld [vmem:[#allocation2 + $0x70] sm:$0xff]   ;;  %v1382_v24 = vmov 1983009808   ;;  %v52_v26 = vlaneseq }
   0xf   :  { %v1256_v1 = vld [vmem:[#allocation2 + $0xf8] sm:$0xff]   ;;  %1102 = vmatprep.subr.bf16.mxu0 %v1255_v0  ;;  %v1260_v5 = vld [vmem:[#allocation2 + $0xf0] sm:$0xff]   ;;  %v1263_v8 = vld [vmem:[#allocation2 + $0x68] sm:$0xff]   ;;  %v50_v25 = vunpack.c.l.s4 %v1382_v24  ;;  %vm1384_vm0 = vmmov 0   ;;  %s1385_s21 = smov [#allocation5]  }
  0x10   :  { %v1257_v2 = vld [vmem:[#allocation2 + $0x38] sm:$0xff]   ;;  %1124 = vmatprep.subr.bf16.mxu1 %v1256_v1  ;;  %v1261_v6 = vld [vmem:[#allocation2 + $0x30] sm:$0xff]   ;;  %v1264_v9 = vld [vmem:[#allocation2 + $0xe8] sm:$0xff]   ;;  %v53_v32 = vshrl.u32 %v52_v26, 7  ;;  %s1010_s22 = sshll.u32 %s1385_s21, 4  ;;  %s1011_s22 = int_to_ptr.vmem [resolvable:$true] %s1010_s22 }
  0x11   :  { %v1258_v3 = vld [vmem:[#allocation2 + $0xb8] sm:$0xff]   ;;  %1103 = vmatpush3.bf16.msra.mxu0 %v1257_v2  ;;  %v1262_v7 = vld [vmem:[#allocation2 + $0xb0] sm:$0xff]   ;;  %v1265_v10 = vld [vmem:[#allocation2 + $0x28] sm:$0xff]   ;;  %v51_v31 = vunpack.c.0.s8 %v50_v25  ;;  %p1360_p6 = scmp.lt.s32.totalorder %s1011_s22, %s1011_s22 }
  0x12   :  { %1125 = vmatpush3.bf16.msra.mxu1 %v1258_v3  ;;  %1104 = vmatprep.subr.bf16.mxu0 %v1259_v4  ;;  %v1266_v11 = vld [vmem:[#allocation2 + $0xa8] sm:$0xff]   ;;  %v1267_v12 = vld [vmem:[#allocation2 + $0x60] sm:$0xff]   ;;  %v1271_v16 = vld [vmem:[#allocation2 + $0x58] sm:$0xff]  }
  0x13   :  { %1126 = vmatprep.subr.bf16.mxu1 %v1260_v5  ;;  %v1268_v13 = vld [vmem:[#allocation2 + $0xe0] sm:$0xff]   ;;  %v1272_v17 = vld [vmem:[#allocation2 + $0xd8] sm:$0xff]   ;;  %v1275_v20 = vld [vmem:[#allocation2 + $0x50] sm:$0xff]   ;;  %v1429_v37 = vsub.s32 %v51_v31, %v53_v32 }
  0x14   :  { %v1269_v14 = vld [vmem:[#allocation2 + $0x20] sm:$0xff]   ;;  %v1273_v18 = vld [vmem:[#allocation2 + $0x18] sm:$0xff]   ;;  %v1276_v21 = vld [vmem:[#allocation2 + $0xd0] sm:$0xff]  }
  0x15   :  { %1105 = vmatpush3.bf16.msra.mxu0 %v1261_v6  ;;  %v1270_v15 = vld [vmem:[#allocation2 + $0xa0] sm:$0xff]   ;;  %v1274_v19 = vld [vmem:[#allocation2 + $0x98] sm:$0xff]   ;;  %v1277_v22 = vld [vmem:[#allocation2 + $0x10] sm:$0xff]  }
  0x16   :  { %1127 = vmatpush3.bf16.msra.mxu1 %v1262_v7  ;;  %1106 = vmatprep.subr.bf16.mxu0 %v1263_v8  ;;  %v1278_v23 = vld [vmem:[#allocation2 + $0x90] sm:$0xff]   ;;  %v1279_v27 = vld [vmem:[#allocation2 + $0x48] sm:$0xff]   ;;  %v1283_v33 = vld [vmem:[#allocation2 + $0x40] sm:$0xff]  }
  0x17   :  { %1128 = vmatprep.subr.bf16.mxu1 %v1264_v9  ;;  %v1280_v28 = vld [vmem:[#allocation2 + $0xc8] sm:$0xff]   ;;  %v1284_v34 = vld [vmem:[#allocation2 + $0xc0] sm:$0xff]   ;;  %v1287_v40 = vld [vmem:[#allocation2 + $0x178] sm:$0xff]  }
  0x18   :  { %v1281_v29 = vld [vmem:[#allocation2 + $0x8] sm:$0xff]   ;;  %v1285_v35 = vld [vmem:[#allocation2] sm:$0xff]   ;;  %v1288_v41 = vld [vmem:[#allocation2 + $0x1f8] sm:$0xff]  }
  0x19   :  { %1107 = vmatpush3.bf16.msra.mxu0 %v1265_v10  ;;  %v1282_v30 = vld [vmem:[#allocation2 + $0x88] sm:$0xff]   ;;  %v1286_v36 = vld [vmem:[#allocation2 + $0x80] sm:$0xff]   ;;  %v1289_v47 = vld [vmem:[#allocation2 + $0x138] sm:$0xff]  }
  0x1a   :  { %1129 = vmatpush3.bf16.msra.mxu1 %v1266_v11  ;;  %1108 = vmatprep.subr.bf16.mxu0 %v1267_v12  ;;  %v42_v38 = vld [vmem:[%s1519_s0] sm:$0xff]  ;;  %v1290_v50 = vld [vmem:[#allocation2 + $0x1b8] sm:$0xff]   ;;  %v1291_v52 = vld [vmem:[#allocation2 + $0x170] sm:$0xff]  }
  0x1b   :  { %1130 = vmatprep.subr.bf16.mxu1 %v1268_v13  ;;  %v44_v39 = vmax.f32 %v42_v38, 0.0  ;;  %v1292_v54 = vld [vmem:[#allocation2 + $0x1f0] sm:$0xff]   ;;  %v1295_v57 = vld [vmem:[#allocation2 + $0x168] sm:$0xff]   ;;  %v1299_v61 = vld [vmem:[#allocation2 + $0x160] sm:$0xff]  }
  0x1c   :  { %v1293_v55 = vld [vmem:[#allocation2 + $0x130] sm:$0xff]   ;;  %v1296_v58 = vld [vmem:[#allocation2 + $0x1e8] sm:$0xff]   ;;  %v1300_v62 = vld [vmem:[#allocation2 + $0x1e0] sm:$0xff]  }
  0x1d   :  { %1109 = vmatpush3.bf16.msra.mxu0 %v1269_v14  ;;  %v55_v42 = vrot.slane %v44_v39, %v1429_v37  ;;  %v48_v43 = vcombine.high %v44_v39, %v44_v39  ;;  %v1294_v56 = vld [vmem:[#allocation2 + $0x1b0] sm:$0xff]   ;;  %v1297_v59 = vld [vmem:[#allocation2 + $0x128] sm:$0xff]   ;;  %v1301_v63 = vld [vmem:[#allocation2 + $0x120] sm:$0xff]  }
  0x1e   :  { %1131 = vmatpush3.bf16.msra.mxu1 %v1270_v15  ;;  %1110 = vmatprep.subr.bf16.mxu0 %v1271_v16  ;;  %v1298_v60 = vld [vmem:[#allocation2 + $0x1a8] sm:$0xff]   ;;  %v1302_v0 = vld [vmem:[#allocation2 + $0x1a0] sm:$0xff]   ;;  %v1303_v1 = vld [vmem:[#allocation2 + $0x158] sm:$0xff]  }
  0x1f   :  { %1132 = vmatprep.subr.bf16.mxu1 %v1272_v17  ;;  %v63_v44 = vcombine.high %v55_v42, %v55_v42  ;;  %v62_v45 = vrot.slane %v48_v43, %v1429_v37  ;;  %v90_v46 = vpack.c.bf16 %v55_v42, %v55_v42  ;;  %v1304_v2 = vld [vmem:[#allocation2 + $0x1d8] sm:$0xff]   ;;  %v1307_v5 = vld [vmem:[#allocation2 + $0x150] sm:$0xff]   ;;  %v1311_v9 = vld [vmem:[#allocation2 + $0x148] sm:$0xff]  }
  0x20   :  { %v1305_v3 = vld [vmem:[#allocation2 + $0x118] sm:$0xff]   ;;  %v1308_v6 = vld [vmem:[#allocation2 + $0x1d0] sm:$0xff]   ;;  %v1312_v10 = vld [vmem:[#allocation2 + $0x1c8] sm:$0xff]  }
  0x21   :  { %1111 = vmatpush3.bf16.msra.mxu0 %v1273_v18  ;;  %v91_v48 = vpack.c.bf16 %v63_v44, %v63_v44  ;;  %v64_v49 = vcombine.high %v62_v45, %v62_v45  ;;  %v92_v51 = vpack.c.bf16 %v62_v45, %v62_v45  ;;  %v1306_v4 = vld [vmem:[#allocation2 + $0x198] sm:$0xff]   ;;  %v1309_v7 = vld [vmem:[#allocation2 + $0x110] sm:$0xff]   ;;  %v1313_v11 = vld [vmem:[#allocation2 + $0x108] sm:$0xff]  }
  0x22   :  { %1133 = vmatpush3.bf16.msra.mxu1 %v1274_v19  ;;  %1112 = vmatprep.subr.bf16.mxu0 %v1275_v20  ;;  %v1310_v8 = vld [vmem:[#allocation2 + $0x190] sm:$0xff]   ;;  %v1314_v12 = vld [vmem:[#allocation2 + $0x188] sm:$0xff]   ;;  %v1315_v13 = vld [vmem:[#allocation2 + $0x140] sm:$0xff]  }
  0x23   :  { %1134 = vmatprep.subr.bf16.mxu1 %v1276_v21  ;;  %649 = vmatprep.mubr.bf16.mxu0 %v91_v48  ;;  %v93_v53 = vpack.c.bf16 %v64_v49, %v64_v49  ;;  %v1316_v14 = vld [vmem:[#allocation2 + $0x1c0] sm:$0xff]   ;;  %v43_v15 = vld [vmem:[%s1519_s0 + $0x8] sm:$0xff]  ;;  %v1328_v38 = vld [vmem:[%s1524_s5 + $0x30] sm:$0xff]  }
  0x24   :  { %v1317_v16 = vld [vmem:[#allocation2 + $0x100] sm:$0xff]   ;;  %v45_v17 = vmax.f32 %v43_v15, 0.0  ;;  %v1321_v31 = vld [vmem:[%s1522_s3 + $0x28] sm:$0xff]   ;;  %v1332_v42 = vld [vmem:[%s1524_s5 + $0x10] sm:$0xff]  }
  0x25   :  { %1113 = vmatpush3.bf16.msra.mxu0 %v1277_v22  ;;  %689 = vmatprep.mubr.bf16.mxu1 %v93_v53  ;;  %v1318_v18 = vld [vmem:[#allocation2 + $0x180] sm:$0xff]   ;;  %v1329_v39 = vld [vmem:[%s1524_s5 + $0x28] sm:$0xff]  }
  0x26   :  { %1135 = vmatpush3.bf16.msra.mxu1 %v1278_v23  ;;  %1114 = vmatprep.subr.bf16.mxu0 %v1279_v27  ;;  %v72_v19 = vrot.slane %v45_v17, %v1429_v37  ;;  %v65_v20 = vcombine.high %v45_v17, %v45_v17  ;;  %v1322_v32 = vld [vmem:[%s1522_s3 + $0x20] sm:$0xff]  }
  0x27   :  { %1136 = vmatprep.subr.bf16.mxu1 %v1280_v28  ;;  %v1319_v28 = vld [vmem:[%s1522_s3 + $0x38] sm:$0xff]  }
  0x28   :  { %v80_v21 = vcombine.high %v72_v19, %v72_v19  ;;  %v79_v22 = vrot.slane %v65_v20, %v1429_v37  ;;  %v94_v23 = vpack.c.bf16 %v72_v19, %v72_v19  ;;  %v1327_v37 = vld [vmem:[%s1524_s5 + $0x38] sm:$0xff]  }
  0x29   :  { %1115 = vmatpush3.bf16.msra.mxu0 %v1281_v29  ;;  %v1383_v29 = vmov 0.0  }
  0x2a   :  { %1137 = vmatpush3.bf16.msra.mxu1 %v1282_v30  ;;  %1116 = vmatprep.subr.bf16.mxu0 %v1283_v33  ;;  %v95_v24 = vpack.c.bf16 %v80_v21, %v80_v21  ;;  %v81_v25 = vcombine.high %v79_v22, %v79_v22  ;;  %v96_v26 = vpack.c.bf16 %v79_v22, %v79_v22  ;;  %v1320_v30 = vld [vmem:[%s1522_s3 + $0x30] sm:$0xff]   ;;  %v1323_v33 = vld [vmem:[%s1522_s3 + $0x18] sm:$0xff]  }
  0x2b   :  { %1138 = vmatprep.subr.bf16.mxu1 %v1284_v34  ;;  %v1324_v34 = vld [vmem:[%s1522_s3 + $0x10] sm:$0xff]  }
  0x2c   :  { %v97_v27 = vpack.c.bf16 %v81_v25, %v81_v25 }
  0x2d   :  { %1117 = vmatpush3.bf16.msra.mxu0 %v1285_v35  ;;  %v1325_v35 = vld [vmem:[%s1522_s3 + $0x8] sm:$0xff]  }
  0x2e   :  { %1139 = vmatpush3.bf16.msra.mxu1 %v1286_v36  ;;  %1146 = vmatprep.subr.bf16.mxu0 %v1287_v40  ;;  %v1326_v36 = vld [vmem:[%s1522_s3] sm:$0xff]  }
  0x2f   :  { %1168 = vmatprep.subr.bf16.mxu1 %v1288_v41  ;;  %v1330_v40 = vld [vmem:[%s1524_s5 + $0x20] sm:$0xff]   ;;  %v1331_v41 = vld [vmem:[%s1524_s5 + $0x18] sm:$0xff]  }
  0x30   :  { %650 = vmatmul.mubr.bf16.vlgmr.msra.gmra.mxu0 %v90_v46 }
  0x31   :  { %1147 = vmatpush3.bf16.msra.mxu0 %v1289_v47  ;;  %690 = vmatmul.mubr.bf16.vlgmr.msra.gmra.mxu1 %v92_v51 }
  0x32   :  { %1148 = vmatprep.subr.bf16.mxu0 %v1291_v52  ;;  %1169 = vmatpush3.bf16.msra.mxu1 %v1290_v50  ;;  %v1019_v52 = vld [vmem:[%s1521_s2] ss:$0 sm:$0xff] }
  0x33   :  { %1170 = vmatprep.subr.bf16.mxu1 %v1292_v54  ;;  %729 = vmatprep.mubr.bf16.mxu0 %v95_v24 }
  0x34   :  { %769 = vmatprep.mubr.bf16.mxu1 %v97_v27 }
  0x35   :  { %1149 = vmatpush3.bf16.msra.mxu0 %v1293_v55 }
  0x36   :  { %1150 = vmatprep.subr.bf16.mxu0 %v1295_v57  ;;  %1171 = vmatpush3.bf16.msra.mxu1 %v1294_v56 }
  0x37   :  { %1172 = vmatprep.subr.bf16.mxu1 %v1296_v58 }
  0x39   :  { %1151 = vmatpush3.bf16.msra.mxu0 %v1297_v59 }
  0x3a   :  { %1152 = vmatprep.subr.bf16.mxu0 %v1299_v61  ;;  %1173 = vmatpush3.bf16.msra.mxu1 %v1298_v60 }
  0x3b   :  { %1174 = vmatprep.subr.bf16.mxu1 %v1300_v62 }
  0x3d   :  { %1153 = vmatpush3.bf16.msra.mxu0 %v1301_v63 }
  0x3e   :  { %1154 = vmatprep.subr.bf16.mxu0 %v1303_v1  ;;  %1175 = vmatpush3.bf16.msra.mxu1 %v1302_v0 }
  0x3f   :  { %1176 = vmatprep.subr.bf16.mxu1 %v1304_v2 }
  0x41   :  { %1155 = vmatpush3.bf16.msra.mxu0 %v1305_v3 }
  0x42   :  { %1156 = vmatprep.subr.bf16.mxu0 %v1307_v5  ;;  %1177 = vmatpush3.bf16.msra.mxu1 %v1306_v4 }
  0x43   :  { %1178 = vmatprep.subr.bf16.mxu1 %v1308_v6  ;;  %v1333_v6 = vld [vmem:[%s1524_s5 + $0x8] sm:$0xff]  }
  0x45   :  { %1157 = vmatpush3.bf16.msra.mxu0 %v1309_v7  ;;  %v1334_v7 = vld [vmem:[%s1524_s5] sm:$0xff]  }
  0x46   :  { %1158 = vmatprep.subr.bf16.mxu0 %v1311_v9  ;;  %1179 = vmatpush3.bf16.msra.mxu1 %v1310_v8  ;;  %v1084_v8 = vld [vmem:[%s1523_s4] ss:$0 sm:$0xff]  ;;  %s1355_s4 = scalar_lea.vmem %s1011_s22, 32 }
  0x47   :  { %1180 = vmatprep.subr.bf16.mxu1 %v1312_v10  ;;  %p1356_p5 = scmp.ne.s32.totalorder %s1011_s22, %s1355_s4  ;;  %p1361_p7 = scmp.lt.s32.totalorder %s1355_s4, %s1355_s4 }
  0x49   :  { %1159 = vmatpush3.bf16.msra.mxu0 %v1313_v11  ;;  %p1362_p8 = por %p1361_p7, %p1360_p6 }
  0x4a   :  { %1160 = vmatprep.subr.bf16.mxu0 %v1315_v13  ;;  %1181 = vmatpush3.bf16.msra.mxu1 %v1314_v12 }
  0x4b   :  { %1182 = vmatprep.subr.bf16.mxu1 %v1316_v14  ;;  %p1363_p9 = pnand %p1362_p8, %p1356_p5 }
  0x4d   :  { %1161 = vmatpush3.bf16.msra.mxu0 %v1317_v16  ;;  %v1093_v16 = vld [vmem:[%s1525_s6] ss:$0 sm:$0xff] }
  0x4e   :  { %1183 = vmatpush3.bf16.msra.mxu1 %v1318_v18  ;;  %1208 = vmatprep.subr.bf16.mxu0 %v1383_v29 }
  0x4f   :  { %1228 = vmatprep.subr.bf16.mxu1 %v1383_v29 }
  0x50   :  { %730 = vmatmul.mubr.bf16.vlgmr.msra.gmra.mxu0 %v94_v23 }
  0x51   :  { %770 = vmatmul.mubr.bf16.vlgmr.msra.gmra.mxu1 %v96_v26  ;;  %1209 = vmatpush3.bf16.msra.mxu0 %v1319_v28 }
  0x52   :  { %1210 = vmatprep.subr.bf16.mxu0 %v1383_v29  ;;  %1224 = vmatprep.mubr.msk.bf16.mxu0 %vm1384_vm0, %v1383_v29 }
  0x53   :  { %1244 = vmatprep.mubr.msk.bf16.mxu1 %vm1384_vm0, %v1383_v29  ;;  %1229 = vmatpush3.bf16.msra.mxu1 %v1327_v37 }
  0x54   :  { %1230 = vmatprep.subr.bf16.mxu1 %v1383_v29 }
  0x55   :  { %1211 = vmatpush3.bf16.msra.mxu0 %v1320_v30 }
  0x56   :  { %1212 = vmatprep.subr.bf16.mxu0 %v1383_v29 }
  0x57   :  { %1231 = vmatpush3.bf16.msra.mxu1 %v1328_v38 }
  0x58   :  { %1232 = vmatprep.subr.bf16.mxu1 %v1383_v29 }
  0x59   :  { %1213 = vmatpush3.bf16.msra.mxu0 %v1321_v31 }
  0x5a   :  { %1214 = vmatprep.subr.bf16.mxu0 %v1383_v29 }
  0x5b   :  { %1233 = vmatpush3.bf16.msra.mxu1 %v1329_v39 }
  0x5c   :  { %1234 = vmatprep.subr.bf16.mxu1 %v1383_v29 }
  0x5d   :  { %1215 = vmatpush3.bf16.msra.mxu0 %v1322_v32 }
  0x5e   :  { %1216 = vmatprep.subr.bf16.mxu0 %v1383_v29 }
  0x5f   :  { %1235 = vmatpush3.bf16.msra.mxu1 %v1330_v40 }
  0x60   :  { %1236 = vmatprep.subr.bf16.mxu1 %v1383_v29 }
  0x61   :  { %1217 = vmatpush3.bf16.msra.mxu0 %v1323_v33 }
  0x62   :  { %1218 = vmatprep.subr.bf16.mxu0 %v1383_v29 }
  0x63   :  { %1237 = vmatpush3.bf16.msra.mxu1 %v1331_v41 }
  0x64   :  { %1238 = vmatprep.subr.bf16.mxu1 %v1383_v29 }
  0x65   :  { %1219 = vmatpush3.bf16.msra.mxu0 %v1324_v34 }
  0x66   :  { %1220 = vmatprep.subr.bf16.mxu0 %v1383_v29 }
  0x67   :  { %1239 = vmatpush3.bf16.msra.mxu1 %v1332_v42 }
  0x68   :  { %1240 = vmatprep.subr.bf16.mxu1 %v1383_v29 }
  0x69   :  { %1221 = vmatpush3.bf16.msra.mxu0 %v1325_v35 }
  0x6a   :  { %1222 = vmatprep.subr.bf16.mxu0 %v1383_v29 }
  0x6b   :  { %1241 = vmatpush3.bf16.msra.mxu1 %v1333_v6 }
  0x6c   :  { %1242 = vmatprep.subr.bf16.mxu1 %v1383_v29 }
  0x6d   :  { %1223 = vmatpush3.bf16.msra.mxu0 %v1326_v36 }
  0x6f   :  { %1243 = vmatpush3.bf16.msra.mxu1 %v1334_v7 }
  0xf0   :  { %v1118_v43 = vpop.f32.mrf.mxu0 }
  0xf1   :  { %v1140_v44 = vpop.f32.mrf.mxu1 }
  0xf2   :  { %v1119_v45 = vpop.f32.mrf.mxu0 }
  0xf3   :  { %v1141_v46 = vpop.f32.mrf.mxu1  ;;  %v1120_v51 = vadd.f32 %v1119_v45, %v1118_v43 }
  0xf4   :  { %v1121_v47 = vpop.f32.mrf.mxu0  ;;  %v1142_v54 = vadd.f32 %v1141_v46, %v1140_v44 }
  0xf5   :  { %v1143_v48 = vpop.f32.mrf.mxu1  ;;  %v652_v53 = vadd.f32 %v1120_v51, %v1019_v52 }
  0xf6   :  { %v1122_v49 = vpop.f32.mrf.mxu0 }
  0xf7   :  { %v1144_v50 = vpop.f32.mrf.mxu1  ;;  %v692_v58 = vadd.f32 %v1142_v54, %v652_v53 }
 0x110   :  { %v1162_v55 = vpop.f32.mrf.mxu0 }
 0x111   :  { %v1184_v56 = vpop.f32.mrf.mxu1 }
 0x112   :  { %v1163_v57 = vpop.f32.mrf.mxu0 }
 0x113   :  { %v1164_v59 = vadd.f32 %v1163_v57, %v1162_v55  ;;  %v1185_v60 = vpop.f32.mrf.mxu1 }
 0x114   :  { %v1165_v61 = vpop.f32.mrf.mxu0  ;;  %v1186_v63 = vadd.f32 %v1185_v60, %v1184_v56 }
 0x115   :  { %v732_v62 = vadd.f32 %v1164_v59, %v692_v58  ;;  %v1187_v0 = vpop.f32.mrf.mxu1 }
 0x116   :  { %v1166_v1 = vpop.f32.mrf.mxu0 }
 0x117   :  { %v772_v2 = vadd.f32 %v1186_v63, %v732_v62  ;;  %v1188_v3 = vpop.f32.mrf.mxu1 }
 0x119   :  { %v777_v4 = vmax.f32 %v772_v2, 0.0 }
 0x11b   :  { %v778_v5 = vpack.c.bf16 %v777_v4, %v777_v4 }
 0x11d   :  { %1225 = vmatmul.mubr.bf16.vlgmr.msra.gmra.mxu0 %v778_v5 }
 0x1dd   :  { %v884_v9 = vpop.f32.mrf.mxu0 }
 0x1de   :  { %v885_v10 = vadd.f32 %v1084_v8, %v884_v9 }
 0x1df   :  { %v1226_v11 = vpop.f32.mrf.mxu0 }
 0x1e0   :  { %v890_v12 = vmax.f32 %v885_v10, 0.0 }
 0x1e1   :  { %v887_v13 = vpop.f32.mrf.mxu0 }
 0x1e2   :  { %v891_v14 = vpack.c.bf16 %v890_v12, %v890_v12 }
 0x1e3   :  { %v1227_v15 = vpop.f32.mrf.mxu0 }
 0x1e4   :  { %1245 = vmatmul.mubr.bf16.vlgmr.msra.gmra.mxu1 %v891_v14 }
 0x2a4   :  { %v997_v17 = vpop.f32.mrf.mxu1 }
 0x2a5   :  { %v998_v18 = vadd.f32 %v1093_v16, %v997_v17 }
 0x2a6   :  { %v1246_v19 = vpop.f32.mrf.mxu1 }
 0x2a7   :  { %1003 = vst [vmem:[#allocation5] sm:$0x3] %v998_v18 }
 0x2a8   :  { %v1000_v20 = vpop.f32.mrf.mxu1 }
 0x2a9   :  { %1366 = shalt.err (!%p1363_p9)
}
 0x2aa   :  { %1013 = dma.vmem_to_hbm [thread:$0]  %s1011_s22, 32, %s1526_s7, [#allocation4]   ;;  %v1247_v21 = vpop.f32.mrf.mxu1 }
 0x2ab   :  { %1377 = dma.done.wait [#allocation4], 32  }
 0x2ac   :  { %1378 = vsyncadd [#allocation4], 4294967264 }
 0x2ad   :  { %1017 = vsyncpa [#allocation3], 1 }
 0x2ae   :  { %1018 = vsyncpa [#allocation4], 1 }

</bundles_post_ra>
